<compile_context>
chip_gen: v7x
topology: tpu7x:2x2x1
jax: 0.10.0
libtpu: 0.0.40
codegen_flags: <defaults>
</compile_context>

<pallas_src>
import functools

import jax
import jax.numpy as jnp
from jax import lax
from jax.experimental import pallas as pl
from jax.experimental.pallas import tpu as pltpu

_LANE = 128                        # last dim should be a multiple of the lane width
_SOFT_VMEM_CAP = 100 << 20         # physical-minus-headroom cap (v5e/v6e 128 MiB)
_FAST_PATH_VMEM_BUDGET = 40 << 20  # resident-table path must fit well under v7x's 64 MiB
_FAST_PATH_MAX_SEQ = 256           # static gather-loop cap (keeps compile time bounded)


def _soft_embedding_vmem_kernel(tokens_ref, emb_ref, prompt_ref, out_ref, *,
                                n_prompts, seq_len, batch_src, vocab_size):
    """Fast path: embedding table resident in VMEM; gather = dynamic vector loads.

    tokens_ref : SMEM (B*S,) int32   scalar-prefetched, flat
    emb_ref    : VMEM (V, H)         resident (constant index_map)
    prompt_ref : VMEM (P, H)         resident
    out_ref    : VMEM (P+S, H)       output block (batch dim squeezed)
    """
    b = pl.program_id(0)
    base = (b % batch_src) * seq_len           # inference replicas reuse source row b % B

    # Prompt rows: one VMEM->VMEM vector store (no per-batch HBM re-read).
    out_ref[pl.ds(0, n_prompts), :] = prompt_ref[...]

    # Embedding gather: dynamic vector load per token, static store destination.
    # seq_len <= _FAST_PATH_MAX_SEQ, so this static unroll stays small.
    for s in range(seq_len):
        tok = jnp.clip(tokens_ref[base + s], 0, vocab_size - 1)
        out_ref[pl.ds(n_prompts + s, 1), :] = emb_ref[pl.ds(tok, 1), :]


def _soft_embedding_hbm_kernel(tokens_ref, emb_hbm, prompt_ref, out_ref, sem, *,
                               n_prompts, seq_len, batch_src, vocab_size,
                               n_inflight, unroll):
    """General path: table stays in HBM; per-row gather DMAs in a semaphore ring.

    tokens_ref : SMEM (B*S,) int32
    emb_hbm    : HBM  (V, H)         raw ref (memory_space=pl.ANY)
    prompt_ref : VMEM (P, H)         resident
    out_ref    : VMEM (P+S, H)       output block (batch dim squeezed)
    sem        : DMA semaphore ring, shape (n_inflight,)
    """
    b = pl.program_id(0)
    base = (b % batch_src) * seq_len

    # Prompt rows from the resident VMEM block: cheap vector store, no HBM DMA.
    out_ref[pl.ds(0, n_prompts), :] = prompt_ref[...]

    def read_tok(s):
        return jnp.clip(tokens_ref[base + s], 0, vocab_size - 1)

    def start_row(s, tok, slot):
        pltpu.make_async_copy(
            emb_hbm.at[pl.ds(tok, 1), :],
            out_ref.at[pl.ds(n_prompts + s, 1), :],
            sem.at[slot]).start()

    def wait_row(slot):
        # Constant-index descriptor: wait() only needs matching size + semaphore,
        # so we skip the per-wait SMEM read / clip / dynamic address math.
        pltpu.make_async_copy(
            emb_hbm.at[pl.ds(0, 1), :],
            out_ref.at[pl.ds(n_prompts, 1), :],
            sem.at[slot]).wait()

    # Prime the ring (wrapper guarantees n_inflight is a power of two <= seq_len).
    for j in range(n_inflight):
        start_row(j, read_tok(j), j)

    def body(s, carry):
        slot = s & (n_inflight - 1)
        nxt = s + n_inflight
        # Scalar work for the *next* start is hoisted ABOVE the wait so the
        # .wait() sst->sld forwarding break cannot stall the SMEM token read.
        tok_nxt = read_tok(jnp.minimum(nxt, seq_len - 1))
        wait_row(slot)

        @pl.when(nxt < seq_len)
        def _():
            start_row(nxt, tok_nxt, slot)

        return carry

    lax.fori_loop(0, seq_len, body, 0, unroll=unroll)


def soft_embedding_forward(tokens, emb_table, prompt_embeds, *,
                           is_train=True, std_list=None,
                           n_inflight=16, unroll=4, force_hbm_gather=False):
    """JAX/Pallas equivalent of SoftEmbedding.forward (prompt + embedding concat)."""
    B, S = tokens.shape
    V, H = emb_table.shape
    P, Hp = prompt_embeds.shape
    if Hp != H:
        raise ValueError("prompt hidden size must match embedding hidden size")
    if is_train:
        sample_size = 1
    else:
        if not std_list:
            raise ValueError("inference mode requires a non-empty std_list "
                             "(call set_gaussian_range first)")
        sample_size = len(std_list)

    dtype = emb_table.dtype
    prompt_embeds = prompt_embeds.astype(dtype)          # DMAs / stores cannot cast

    # Lane-align the hidden dim so row transfers and the output writeback are
    # fully lane-dense; slice the pad off afterwards.
    H_pad = ((H + _LANE - 1) // _LANE) * _LANE
    if H_pad != H:
        emb_table = jnp.pad(emb_table, ((0, 0), (0, H_pad - H)))
        prompt_embeds = jnp.pad(prompt_embeds, ((0, 0), (0, H_pad - H)))

    b_out = sample_size * B                               # inference repeats along batch
    rows = P + S
    itemsize = jnp.dtype(dtype).itemsize
    out_block_bytes = rows * H_pad * itemsize
    table_bytes = V * H_pad * itemsize
    prompt_bytes = P * H_pad * itemsize

    # Resident-table fast path: table + prompt + double-buffered output block all
    # comfortably within VMEM (conservative vs v7x's 64 MiB per-TC VMEM).
    fast_bytes = 2 * (table_bytes + prompt_bytes + out_block_bytes)
    use_fast = ((not force_hbm_gather)
                and S <= _FAST_PATH_MAX_SEQ
                and fast_bytes <= _FAST_PATH_VMEM_BUDGET)

    tokens_flat = tokens.reshape(-1).astype(jnp.int32)

    if use_fast:
        kernel = functools.partial(
            _soft_embedding_vmem_kernel,
            n_prompts=P, seq_len=S, batch_src=B, vocab_size=V)
        in_specs = [
            pl.BlockSpec((V, H_pad), lambda b, tok: (0, 0)),   # table resident in VMEM
            pl.BlockSpec((P, H_pad), lambda b, tok: (0, 0)),   # prompt resident in VMEM
        ]
        scratch_shapes = []
        vmem_needed = fast_bytes + (2 << 20)
    else:
        ndma = min(max(1, int(n_inflight)), S)
        ndma = 1 << (ndma.bit_length() - 1)                    # power of two <= S
        kernel = functools.partial(
            _soft_embedding_hbm_kernel,
            n_prompts=P, seq_len=S, batch_src=B, vocab_size=V,
            n_inflight=ndma, unroll=max(1, int(unroll)))
        in_specs = [
            pl.BlockSpec(memory_space=pl.ANY),                 # table stays in HBM
            pl.BlockSpec((P, H_pad), lambda b, tok: (0, 0)),   # prompt resident in VMEM
        ]
        scratch_shapes = [pltpu.SemaphoreType.DMA((ndma,))]
        vmem_needed = 2 * (out_block_bytes + prompt_bytes) + (2 << 20)

    vmem_limit = int(min(max(vmem_needed, 32 << 20), _SOFT_VMEM_CAP))

    grid_spec = pltpu.PrefetchScalarGridSpec(
        num_scalar_prefetch=1,                                 # flat tokens land in SMEM
        grid=(b_out,),
        in_specs=in_specs,
        out_specs=pl.BlockSpec((None, rows, H_pad), lambda b, tok: (b, 0, 0)),
        scratch_shapes=scratch_shapes,
    )

    out = pl.pallas_call(
        kernel,
        out_shape=jax.ShapeDtypeStruct((b_out, rows, H_pad), dtype),
        grid_spec=grid_spec,
        compiler_params=pltpu.CompilerParams(
            dimension_semantics=("parallel",),  # batch rows shard across TCs (megacore)
            vmem_limit_bytes=vmem_limit),
    )(tokens_flat, emb_table, prompt_embeds)

    if H_pad != H:
        out = out[..., :H]
    return out


if __name__ == "__main__":
    # Deterministic, synthetic "checkpoint".
    V, H, P = 32, 128, 4          # vocab, hidden_size, n_prompts
    B, S = 2, 8                   # batch, seq_length

    key = jax.random.PRNGKey(0)
    k_emb, k_prompt, k_tok = jax.random.split(key, 3)
    emb_table = jax.random.normal(k_emb, (V, H), dtype=jnp.float32)      # wte.weight
    prompt_embeds = jax.random.normal(k_prompt, (P, H), dtype=jnp.float32)
    tokens = jax.random.randint(k_tok, (B, S), 0, V, dtype=jnp.int32)

    # Pure-JAX references.
    ref_train = jnp.concatenate(
        [jnp.broadcast_to(prompt_embeds[None], (B, P, H)), emb_table[tokens]], axis=1)
    std_list = [0.1, 0.2, 0.3]
    ref_infer = jnp.tile(ref_train, (len(std_list), 1, 1))

    # --- Fast path (VMEM-resident table), train + infer ---
    out_tr = jax.block_until_ready(
        soft_embedding_forward(tokens, emb_table, prompt_embeds, is_train=True))
    assert out_tr.shape == (B, P + S, H)
    assert jnp.allclose(out_tr, ref_train, atol=1e-6), "mismatch (train, fast path)"

    out_inf = jax.block_until_ready(
        soft_embedding_forward(tokens, emb_table, prompt_embeds,
                               is_train=False, std_list=std_list))
    assert out_inf.shape == (len(std_list) * B, P + S, H)
    assert jnp.allclose(out_inf, ref_infer, atol=1e-6), "mismatch (infer, fast path)"

    # --- General path (HBM gather, DMA ring) forced, train + infer ---
    out_tr_h = jax.block_until_ready(
        soft_embedding_forward(tokens, emb_table, prompt_embeds, is_train=True,
                               force_hbm_gather=True))
    assert jnp.allclose(out_tr_h, ref_train, atol=1e-6), "mismatch (train, HBM path)"

    out_inf_h = jax.block_until_ready(
        soft_embedding_forward(tokens, emb_table, prompt_embeds, is_train=False,
                               std_list=std_list, force_hbm_gather=True))
    assert jnp.allclose(out_inf_h, ref_infer, atol=1e-6), "mismatch (infer, HBM path)"

    print("KERNEL_OK")
</pallas_src>

<mosaic_0001>
module attributes {stable_mosaic.version = 11 : i64} {
  func.func @_soft_embedding_vmem_kernel(%arg0: i32, %arg1: memref<16xi32, #tpu.memory_space<smem>>, %arg2: memref<32x128xf32, #tpu.memory_space<vmem>>, %arg3: memref<4x128xf32, #tpu.memory_space<vmem>>, %arg4: memref<1x12x128xf32, #tpu.memory_space<vmem>>) attributes {dimension_semantics = [#tpu.dimension_semantics<parallel>], iteration_bounds = array<i64: 2>, scalar_prefetch = 1 : i64, scratch_operands = 0 : i64, tpu.core_type = #tpu.core_type<tc>, window_params = [{pipeline_mode = #tpu.pipeline_mode<synchronous>, transform_indices = @transform_0, window_bounds = array<i64: 32, 128>}, {pipeline_mode = #tpu.pipeline_mode<synchronous>, transform_indices = @transform_1, window_bounds = array<i64: 4, 128>}, {transform_indices = @transform_2, window_bounds = array<i64: 1, 12, 128>}]} {
    %c2_i32 = arith.constant 2 : i32
    %c0_i32 = arith.constant 0 : i32
    %0 = arith.cmpi eq, %c2_i32, %c0_i32 : i32
    %c1_i32 = arith.constant 1 : i32
    %1 = arith.select %0, %c1_i32, %c2_i32 : i32
    %2 = arith.remsi %arg0, %1 : i32
    %c0_i32_0 = arith.constant 0 : i32
    %3 = arith.cmpi ne, %2, %c0_i32_0 : i32
    %c0_i32_1 = arith.constant 0 : i32
    %4 = arith.cmpi slt, %2, %c0_i32_1 : i32
    %c0_i32_2 = arith.constant 0 : i32
    %5 = arith.cmpi slt, %1, %c0_i32_2 : i32
    %6 = arith.xori %4, %5 : i1
    %7 = arith.andi %6, %3 : i1
    %8 = arith.addi %2, %1 : i32
    %9 = arith.select %7, %8, %2 : i32
    %c8_i32 = arith.constant 8 : i32
    %10 = arith.muli %9, %c8_i32 : i32
    %c0 = arith.constant 0 : index
    %c0_3 = arith.constant 0 : index
    %11 = vector.load %arg3[%c0, %c0_3] : memref<4x128xf32, #tpu.memory_space<vmem>>, vector<4x128xf32>
    %c0_4 = arith.constant 0 : index
    %c0_5 = arith.constant 0 : index
    %c0_6 = arith.constant 0 : index
    %12 = vector.load %arg4[%c0_4, %c0_5, %c0_6] : memref<1x12x128xf32, #tpu.memory_space<vmem>>, vector<1x4x128xf32>
    %13 = vector.shape_cast %12 : vector<1x4x128xf32> to vector<4x128xf32>
    %14 = vector.shape_cast %11 : vector<4x128xf32> to vector<1x4x128xf32>
    tpu.vector_store %arg4[%c0_4, %c0_5, %c0_6], %14 {strides = array<i32>} : memref<1x12x128xf32, #tpu.memory_space<vmem>>, vector<1x4x128xf32>,
    %c0_i32_7 = arith.constant 0 : i32
    %15 = arith.addi %10, %c0_i32_7 : i32
    %16 = arith.index_cast %15 : i32 to index
    %17 = memref.load %arg1[%16] : memref<16xi32, #tpu.memory_space<smem>>
    %c0_i32_8 = arith.constant 0 : i32
    %c31_i32 = arith.constant 31 : i32
    %18 = arith.maxsi %c0_i32_8, %17 : i32
    %19 = arith.minsi %c31_i32, %18 : i32
    %20 = arith.index_cast %19 : i32 to index
    %c0_9 = arith.constant 0 : index
    %21 = vector.load %arg2[%20, %c0_9] : memref<32x128xf32, #tpu.memory_space<vmem>>, vector<1x128xf32>
    %c0_10 = arith.constant 0 : index
    %c4 = arith.constant 4 : index
    %c0_11 = arith.constant 0 : index
    %22 = vector.load %arg4[%c0_10, %c4, %c0_11] : memref<1x12x128xf32, #tpu.memory_space<vmem>>, vector<1x1x128xf32>
    %23 = vector.shape_cast %22 : vector<1x1x128xf32> to vector<1x128xf32>
    %24 = vector.shape_cast %21 : vector<1x128xf32> to vector<1x1x128xf32>
    tpu.vector_store %arg4[%c0_10, %c4, %c0_11], %24 {strides = array<i32>} : memref<1x12x128xf32, #tpu.memory_space<vmem>>, vector<1x1x128xf32>,
    %c1_i32_12 = arith.constant 1 : i32
    %25 = arith.addi %10, %c1_i32_12 : i32
    %26 = arith.index_cast %25 : i32 to index
    %27 = memref.load %arg1[%26] : memref<16xi32, #tpu.memory_space<smem>>
    %c0_i32_13 = arith.constant 0 : i32
    %c31_i32_14 = arith.constant 31 : i32
    %28 = arith.maxsi %c0_i32_13, %27 : i32
    %29 = arith.minsi %c31_i32_14, %28 : i32
    %30 = arith.index_cast %29 : i32 to index
    %c0_15 = arith.constant 0 : index
    %31 = vector.load %arg2[%30, %c0_15] : memref<32x128xf32, #tpu.memory_space<vmem>>, vector<1x128xf32>
    %c0_16 = arith.constant 0 : index
    %c5 = arith.constant 5 : index
    %c0_17 = arith.constant 0 : index
    %32 = vector.load %arg4[%c0_16, %c5, %c0_17] : memref<1x12x128xf32, #tpu.memory_space<vmem>>, vector<1x1x128xf32>
    %33 = vector.shape_cast %32 : vector<1x1x128xf32> to vector<1x128xf32>
    %34 = vector.shape_cast %31 : vector<1x128xf32> to vector<1x1x128xf32>
    tpu.vector_store %arg4[%c0_16, %c5, %c0_17], %34 {strides = array<i32>} : memref<1x12x128xf32, #tpu.memory_space<vmem>>, vector<1x1x128xf32>,
    %c2_i32_18 = arith.constant 2 : i32
    %35 = arith.addi %10, %c2_i32_18 : i32
    %36 = arith.index_cast %35 : i32 to index
    %37 = memref.load %arg1[%36] : memref<16xi32, #tpu.memory_space<smem>>
    %c0_i32_19 = arith.constant 0 : i32
    %c31_i32_20 = arith.constant 31 : i32
    %38 = arith.maxsi %c0_i32_19, %37 : i32
    %39 = arith.minsi %c31_i32_20, %38 : i32
    %40 = arith.index_cast %39 : i32 to index
    %c0_21 = arith.constant 0 : index
    %41 = vector.load %arg2[%40, %c0_21] : memref<32x128xf32, #tpu.memory_space<vmem>>, vector<1x128xf32>
    %c0_22 = arith.constant 0 : index
    %c6 = arith.constant 6 : index
    %c0_23 = arith.constant 0 : index
    %42 = vector.load %arg4[%c0_22, %c6, %c0_23] : memref<1x12x128xf32, #tpu.memory_space<vmem>>, vector<1x1x128xf32>
    %43 = vector.shape_cast %42 : vector<1x1x128xf32> to vector<1x128xf32>
    %44 = vector.shape_cast %41 : vector<1x128xf32> to vector<1x1x128xf32>
    tpu.vector_store %arg4[%c0_22, %c6, %c0_23], %44 {strides = array<i32>} : memref<1x12x128xf32, #tpu.memory_space<vmem>>, vector<1x1x128xf32>,
    %c3_i32 = arith.constant 3 : i32
    %45 = arith.addi %10, %c3_i32 : i32
    %46 = arith.index_cast %45 : i32 to index
    %47 = memref.load %arg1[%46] : memref<16xi32, #tpu.memory_space<smem>>
    %c0_i32_24 = arith.constant 0 : i32
    %c31_i32_25 = arith.constant 31 : i32
    %48 = arith.maxsi %c0_i32_24, %47 : i32
    %49 = arith.minsi %c31_i32_25, %48 : i32
    %50 = arith.index_cast %49 : i32 to index
    %c0_26 = arith.constant 0 : index
    %51 = vector.load %arg2[%50, %c0_26] : memref<32x128xf32, #tpu.memory_space<vmem>>, vector<1x128xf32>
    %c0_27 = arith.constant 0 : index
    %c7 = arith.constant 7 : index
    %c0_28 = arith.constant 0 : index
    %52 = vector.load %arg4[%c0_27, %c7, %c0_28] : memref<1x12x128xf32, #tpu.memory_space<vmem>>, vector<1x1x128xf32>
    %53 = vector.shape_cast %52 : vector<1x1x128xf32> to vector<1x128xf32>
    %54 = vector.shape_cast %51 : vector<1x128xf32> to vector<1x1x128xf32>
    tpu.vector_store %arg4[%c0_27, %c7, %c0_28], %54 {strides = array<i32>} : memref<1x12x128xf32, #tpu.memory_space<vmem>>, vector<1x1x128xf32>,
    %c4_i32 = arith.constant 4 : i32
    %55 = arith.addi %10, %c4_i32 : i32
    %56 = arith.index_cast %55 : i32 to index
    %57 = memref.load %arg1[%56] : memref<16xi32, #tpu.memory_space<smem>>
    %c0_i32_29 = arith.constant 0 : i32
    %c31_i32_30 = arith.constant 31 : i32
    %58 = arith.maxsi %c0_i32_29, %57 : i32
    %59 = arith.minsi %c31_i32_30, %58 : i32
    %60 = arith.index_cast %59 : i32 to index
    %c0_31 = arith.constant 0 : index
    %61 = vector.load %arg2[%60, %c0_31] : memref<32x128xf32, #tpu.memory_space<vmem>>, vector<1x128xf32>
    %c0_32 = arith.constant 0 : index
    %c8 = arith.constant 8 : index
    %c0_33 = arith.constant 0 : index
    %62 = vector.load %arg4[%c0_32, %c8, %c0_33] : memref<1x12x128xf32, #tpu.memory_space<vmem>>, vector<1x1x128xf32>
    %63 = vector.shape_cast %62 : vector<1x1x128xf32> to vector<1x128xf32>
    %64 = vector.shape_cast %61 : vector<1x128xf32> to vector<1x1x128xf32>
    tpu.vector_store %arg4[%c0_32, %c8, %c0_33], %64 {strides = array<i32>} : memref<1x12x128xf32, #tpu.memory_space<vmem>>, vector<1x1x128xf32>,
    %c5_i32 = arith.constant 5 : i32
    %65 = arith.addi %10, %c5_i32 : i32
    %66 = arith.index_cast %65 : i32 to index
    %67 = memref.load %arg1[%66] : memref<16xi32, #tpu.memory_space<smem>>
    %c0_i32_34 = arith.constant 0 : i32
    %c31_i32_35 = arith.constant 31 : i32
    %68 = arith.maxsi %c0_i32_34, %67 : i32
    %69 = arith.minsi %c31_i32_35, %68 : i32
    %70 = arith.index_cast %69 : i32 to index
    %c0_36 = arith.constant 0 : index
    %71 = vector.load %arg2[%70, %c0_36] : memref<32x128xf32, #tpu.memory_space<vmem>>, vector<1x128xf32>
    %c0_37 = arith.constant 0 : index
    %c9 = arith.constant 9 : index
    %c0_38 = arith.constant 0 : index
    %72 = vector.load %arg4[%c0_37, %c9, %c0_38] : memref<1x12x128xf32, #tpu.memory_space<vmem>>, vector<1x1x128xf32>
    %73 = vector.shape_cast %72 : vector<1x1x128xf32> to vector<1x128xf32>
    %74 = vector.shape_cast %71 : vector<1x128xf32> to vector<1x1x128xf32>
    tpu.vector_store %arg4[%c0_37, %c9, %c0_38], %74 {strides = array<i32>} : memref<1x12x128xf32, #tpu.memory_space<vmem>>, vector<1x1x128xf32>,
    %c6_i32 = arith.constant 6 : i32
    %75 = arith.addi %10, %c6_i32 : i32
    %76 = arith.index_cast %75 : i32 to index
    %77 = memref.load %arg1[%76] : memref<16xi32, #tpu.memory_space<smem>>
    %c0_i32_39 = arith.constant 0 : i32
    %c31_i32_40 = arith.constant 31 : i32
    %78 = arith.maxsi %c0_i32_39, %77 : i32
    %79 = arith.minsi %c31_i32_40, %78 : i32
    %80 = arith.index_cast %79 : i32 to index
    %c0_41 = arith.constant 0 : index
    %81 = vector.load %arg2[%80, %c0_41] : memref<32x128xf32, #tpu.memory_space<vmem>>, vector<1x128xf32>
    %c0_42 = arith.constant 0 : index
    %c10 = arith.constant 10 : index
    %c0_43 = arith.constant 0 : index
    %82 = vector.load %arg4[%c0_42, %c10, %c0_43] : memref<1x12x128xf32, #tpu.memory_space<vmem>>, vector<1x1x128xf32>
    %83 = vector.shape_cast %82 : vector<1x1x128xf32> to vector<1x128xf32>
    %84 = vector.shape_cast %81 : vector<1x128xf32> to vector<1x1x128xf32>
    tpu.vector_store %arg4[%c0_42, %c10, %c0_43], %84 {strides = array<i32>} : memref<1x12x128xf32, #tpu.memory_space<vmem>>, vector<1x1x128xf32>,
    %c7_i32 = arith.constant 7 : i32
    %85 = arith.addi %10, %c7_i32 : i32
    %86 = arith.index_cast %85 : i32 to index
    %87 = memref.load %arg1[%86] : memref<16xi32, #tpu.memory_space<smem>>
    %c0_i32_44 = arith.constant 0 : i32
    %c31_i32_45 = arith.constant 31 : i32
    %88 = arith.maxsi %c0_i32_44, %87 : i32
    %89 = arith.minsi %c31_i32_45, %88 : i32
    %90 = arith.index_cast %89 : i32 to index
    %c0_46 = arith.constant 0 : index
    %91 = vector.load %arg2[%90, %c0_46] : memref<32x128xf32, #tpu.memory_space<vmem>>, vector<1x128xf32>
    %c0_47 = arith.constant 0 : index
    %c11 = arith.constant 11 : index
    %c0_48 = arith.constant 0 : index
    %92 = vector.load %arg4[%c0_47, %c11, %c0_48] : memref<1x12x128xf32, #tpu.memory_space<vmem>>, vector<1x1x128xf32>
    %93 = vector.shape_cast %92 : vector<1x1x128xf32> to vector<1x128xf32>
    %94 = vector.shape_cast %91 : vector<1x128xf32> to vector<1x1x128xf32>
    tpu.vector_store %arg4[%c0_47, %c11, %c0_48], %94 {strides = array<i32>} : memref<1x12x128xf32, #tpu.memory_space<vmem>>, vector<1x1x128xf32>,
    return
  }
  func.func @transform_0(%arg0: i32, %arg1: memref<16xi32, #tpu.memory_space<smem>>) -> (i32, i32) {
    %c0_i32 = arith.constant 0 : i32
    %c0_i32_0 = arith.constant 0 : i32
    %c0_i32_1 = arith.constant 0 : i32
    return %c0_i32, %c0_i32_0 : i32, i32
  }
  func.func @transform_1(%arg0: i32, %arg1: memref<16xi32, #tpu.memory_space<smem>>) -> (i32, i32) {
    %c0_i32 = arith.constant 0 : i32
    %c0_i32_0 = arith.constant 0 : i32
    %c0_i32_1 = arith.constant 0 : i32
    return %c0_i32, %c0_i32_0 : i32, i32
  }
  func.func @transform_2(%arg0: i32, %arg1: memref<16xi32, #tpu.memory_space<smem>>) -> (i32, i32, i32) {
    %c0_i32 = arith.constant 0 : i32
    %c0_i32_0 = arith.constant 0 : i32
    %c0_i32_1 = arith.constant 0 : i32
    return %arg0, %c0_i32, %c0_i32_0 : i32, i32, i32
  }
}

</mosaic_0001>

<bundles_post_ra>
// kernel: tpu_custom_call.1
= control target key start
LH: loop header
LB: loop body
LE: loop exit
PB: predicated region body
PF: predicated region fallthrough
CT: control target
= control target key end

     0   :  { %s571_s0 = inlined_call_operand.hbm [shape: s32[16], index: 0, kind: input, shape index: {}]   ;;  %s572_s1 = inlined_call_operand.hbm [shape: f32[32,128], index: 1, kind: input, shape index: {}]   ;;  %s573_s2 = inlined_call_operand.vmem [shape: f32[4,128], index: 2, kind: input, shape index: {}]   ;;  %s574_s3 = inlined_call_operand.vmem [shape: f32[2,12,128], index: 3, kind: output, shape index: {}]  }
   0x1   :  { %s386_s14 = scalar_lea.hbm %s571_s0, 16 }
   0x2   :  { %p387_p0 = scmp.ne.s32.totalorder %s571_s0, %s386_s14  ;;  %p390_p1 = scmp.lt.u32.totalorder %s386_s14, %s571_s0 }
   0x4   :  { %p392_p2 = pnand %p390_p1, %p387_p0 }
   0x6   :  { %395 = shalt.err (!%p392_p2)  }
   0x7   :  { %s438_s19 = smov [#allocation3]  }
   0x8   :  { %9 = dma.hbm_to_smem %s571_s0, 16, %s438_s19, [#allocation2] }
   0x9   :  { %428 = dma.done.wait [#allocation2], 16 }
   0xa   :  { %429 = vsyncadd [#allocation2], 4294967280 }
   0xb   :  { %11 = sfence }
   0xc   :  { %12 = vsyncpa [#allocation5], 0  ;;  %s474_s22 = smov 0  }
   0xd LB: > { %s480_s23 = sadd.s32 4294967295, %s436_s22   ;;  %p295_p3 = scmp.ge.s32.totalorder %s436_s22, 1  ;;  %s436_s22 = sphi %s474_s22, %s18_s22  }
   0xe   : > { %p91_p4 = scmp.lt.s32.totalorder %s436_s22, 3  ;;  %s439_s0 = smov [#allocation4]  }
   0xf   : > { %s103_s24 = sshll.u32 %s439_s0, 4  ;;  %p575_p6 = scmp.eq.s32.totalorder %s480_s23, 0  ;;  %s104_s24 = int_to_ptr.vmem [resolvable:$true] %s103_s24 }
  0x10   : > { %p484_p5 = pnand %p295_p3, %p91_p4  ;;  %s396_s29 = scalar_lea.hbm %s572_s1, 512 }
  0x11   : > { %p397_p9 = scmp.ne.s32.totalorder %s572_s1, %s396_s29  ;;  %p403_p13 = scmp.lt.u32.totalorder %s396_s29, %s572_s1 }
  0x12   : > { %s577_s25 = scalar_select %p484_p5, 1, 0 }
  0x13   : > { %p368_p7 = pneg %p484_p5 }
  0x15   : > { %p493_p8 = pnand %p575_p6, %p368_p7 }
  0x17   : > { %p398_p10 = pneg %p493_p8 }
  0x19   : > { %p399_p11 = pnand %p398_p10, %p397_p9 }
  0x1b   : > { %p400_p12 = pneg %p399_p11 }
  0x1d   : > { %p405_p0 = pnand %p403_p13, %p400_p12 }
  0x1f   : > { %408 = shalt.err (!%p405_p0)
}
  0x20   : > { %s409_s7 = scalar_lea.vmem %s104_s24, 512  ;;  %p417_p4 = scmp.lt.s32.totalorder %s104_s24, %s104_s24 }
  0x21   : > { %p410_p1 = scmp.ne.s32.totalorder %s104_s24, %s409_s7  ;;  %p418_p7 = scmp.lt.s32.totalorder %s409_s7, %s409_s7 }
  0x23   : > { %p412_p2 = pnand %p410_p1, %p398_p10  ;;  %p419_p6 = por %p418_p7, %p417_p4 }
  0x25   : > { %p413_p3 = pneg %p412_p2 }
  0x27   : > { %p420_p5 = pnand %p419_p6, %p413_p3 }
  0x29   : > { %423 = shalt.err (!%p420_p5)
}
  0x2a   : > { %s440_s8 = smov 128   ;;  %s441_s9 = smov 8  }
  0x2b   : > { %371 = dma.hbm_to_vmem [thread:$0]  (!%p493_p8), %s572_s1, 512, %s104_s24, [#allocation5], %s440_s8, %s440_s8, %s441_s9  }
  0x2c   : > { %p579_p9 = scmp.ne.s32.totalorder %s577_s25, 0 }
  0x2d   : > { %p580_p11 = scmp.eq.s32.totalorder (!%p579_p9), %s480_s23, 0 }
  0x2e   : > { %122 = sbr.rel (%p579_p9) target bundleno = 100 (0x64), region = 28 }
  0x35   : > { %431 = dma.done.wait (%p580_p11), [#allocation5], 512   ;;  %p581_p10 = pmov %p580_p11 }
  0x36   : > { %p139_p5 = scmp.lt.s32.totalorder %s480_s23, 1  ;;  %p144_p6 = scmp.lt.s32.totalorder %s480_s23, 0  ;;  %v157_v0 = vld [vmem:[%s573_s2] sm:$0xf] }
  0x37   : > { %433 = vsyncadd (%p581_p10), [#allocation5], 4294966784  ;;  %s145_s12 = ssub.s32 0, %s480_s23 }
  0x38   : > { %s140_s13 = scalar_select %p139_p5, %s480_s23, 1 }
  0x39   : > { %s301_s14 = smin.u32 %s480_s23, %s145_s12 }
  0x3a   : > { %s347_s15 = sshll.u32 %s140_s13, 4  ;;  %s147_s16 = sand.u32 1, %s301_s14  }
  0x3b   : > { %s527_s19 = scalar_lea.vmem %s574_s3, %s347_s15  ;;  %s148_s20 = ssub.s32 0, %s147_s16 }
  0x3c   : > { %s583_s20 = smov (!%p144_p6, %s148_s20), %s147_s16  ;;  %158 = vst [vmem:[%s527_s19] sm:$0xf] %v157_v0 }
  0x3d   : > { %p303_p8 = scmp.lt.s32.totalorder %s583_s20, 0  ;;  %s154_s24 = sadd.s32 2, %s583_s20 }
  0x3f   : > { %s585_s24 = smov (!%p303_p8, %s154_s24), %s583_s20 }
  0x40   : > { %s533_s25 = sshll.u32 %s585_s24, 3 }
  0x41   : > { %s159_s23 = sld [smem:[#allocation3 + %s533_s25]]  ;;  %s167_s26 = sadd.s32 1, %s533_s25 }
  0x42   : > { %s168_s27 = sld [smem:[#allocation3 + %s167_s26]]  ;;  %s176_s28 = sadd.s32 2, %s533_s25 }
  0x43   : > { %s177_s29 = sld [smem:[#allocation3 + %s176_s28]]  ;;  %s185_s30 = sadd.s32 3, %s533_s25 }
  0x44   : > { %s539_s4 = sld [smem:[#allocation3 + %s185_s30]]  ;;  %s194_s5 = sadd.s32 4, %s533_s25 }
  0x45   : > { %s542_s6 = sld [smem:[#allocation3 + %s194_s5]]  ;;  %s203_s7 = sadd.s32 5, %s533_s25 }
  0x46   : > { %s545_s8 = sld [smem:[#allocation3 + %s203_s7]]  ;;  %s212_s9 = sadd.s32 6, %s533_s25 }
  0x47   : > { %p160_p12 = scmp.gt.s32.totalorder %s159_s23, 0  ;;  %p305_p13 = scmp.lt.s32.totalorder %s159_s23, 31 }
  0x48   : > { %p169_p0 = scmp.gt.s32.totalorder %s168_s27, 0  ;;  %p310_p1 = scmp.lt.s32.totalorder %s168_s27, 31 }
  0x49   : > { %s587_s23 = smov (!%p160_p12, %s159_s23), 0  ;;  %p178_p2 = scmp.gt.s32.totalorder %s177_s29, 0 }
  0x4a   : > { %s589_s27 = smov (!%p169_p0, %s168_s27), 0  ;;  %s591_s23 = smov (!%p305_p13, %s587_s23), 31 }
  0x4b   : > { %s593_s27 = smov (!%p310_p1, %s589_s27), 31  ;;  %s164_s10 = scalar_lea.vmem [#allocation4], %s591_s23 }
  0x4c   : > { %v165_v1 = vld [vmem:[%s164_s10] sm:$0x1]  ;;  %p315_p3 = scmp.lt.s32.totalorder %s177_s29, 31  ;;  %s173_s11 = scalar_lea.vmem [#allocation4], %s593_s27 }
  0x4d   : > { %166 = vst [vmem:[%s527_s19 + $0x4] sm:$0x1] %v165_v1  ;;  %v174_v2 = vld [vmem:[%s173_s11] sm:$0x1]  ;;  %s595_s29 = smov (!%p178_p2, %s177_s29), 0  ;;  %p187_p4 = scmp.gt.s32.totalorder %s539_s4, 0 }
  0x4e   : > { %175 = vst [vmem:[%s527_s19 + $0x5] sm:$0x1] %v174_v2  ;;  %p320_p7 = scmp.lt.s32.totalorder %s539_s4, 31  ;;  %s597_s29 = smov (!%p315_p3, %s595_s29), 31 }
  0x4f   : > { %s599_s4 = smov (!%p187_p4, %s539_s4), 0  ;;  %p196_p9 = scmp.gt.s32.totalorder %s542_s6, 0 }
  0x50   : > { %s182_s12 = scalar_lea.vmem [#allocation4], %s597_s29  ;;  %s601_s4 = smov (!%p320_p7, %s599_s4), 31 }
  0x51   : > { %v183_v3 = vld [vmem:[%s182_s12] sm:$0x1]  ;;  %s197_s13 = scalar_select %p196_p9, %s542_s6, 0 }
  0x52   : > { %184 = vst [vmem:[%s527_s19 + $0x6] sm:$0x1] %v183_v3  ;;  %p325_p11 = scmp.lt.s32.totalorder %s542_s6, 31  ;;  %s191_s14 = scalar_lea.vmem [#allocation4], %s601_s4 }
  0x53   : > { %v192_v4 = vld [vmem:[%s191_s14] sm:$0x1]  ;;  %p205_p10 = scmp.gt.s32.totalorder %s545_s8, 0  ;;  %p330_p5 = scmp.lt.s32.totalorder %s545_s8, 31 }
  0x54   : > { %193 = vst [vmem:[%s527_s19 + $0x7] sm:$0x1] %v192_v4  ;;  %s603_s13 = smov (!%p325_p11, %s197_s13), 31  ;;  %s213_s15 = sld [smem:[#allocation3 + %s212_s9]] }
  0x55   : > { %s605_s8 = smov (!%p205_p10, %s545_s8), 0  ;;  %s200_s16 = scalar_lea.vmem [#allocation4], %s603_s13 }
  0x56   : > { %v201_v5 = vld [vmem:[%s200_s16] sm:$0x1]  ;;  %s607_s8 = smov (!%p330_p5, %s605_s8), 31  ;;  %s221_s17 = sadd.s32 7, %s533_s25 }
  0x57   : > { %202 = vst [vmem:[%s527_s19 + $0x8] sm:$0x1] %v201_v5  ;;  %s222_s18 = sld [smem:[#allocation3 + %s221_s17]]  ;;  %s209_s20 = scalar_lea.vmem [#allocation4], %s607_s8 }
  0x58   : > { %v210_v6 = vld [vmem:[%s209_s20] sm:$0x1] }
  0x59   : > { %211 = vst [vmem:[%s527_s19 + $0x9] sm:$0x1] %v210_v6 }
  0x5a   : > { %p214_p6 = scmp.gt.s32.totalorder %s213_s15, 0  ;;  %p335_p8 = scmp.lt.s32.totalorder %s213_s15, 31 }
  0x5c   : > { %s609_s15 = smov (!%p214_p6, %s213_s15), 0 }
  0x5d   : > { %p223_p12 = scmp.gt.s32.totalorder %s222_s18, 0  ;;  %p340_p13 = scmp.lt.s32.totalorder %s222_s18, 31 }
  0x5e   : > { %s611_s15 = smov (!%p335_p8, %s609_s15), 31 }
  0x5f   : > { %s613_s18 = smov (!%p223_p12, %s222_s18), 0  ;;  %s218_s21 = scalar_lea.vmem [#allocation4], %s611_s15 }
  0x60   : > { %v219_v7 = vld [vmem:[%s218_s21] sm:$0x1]  ;;  %s615_s18 = smov (!%p340_p13, %s613_s18), 31 }
  0x61   : > { %220 = vst [vmem:[%s527_s19 + $0xa] sm:$0x1] %v219_v7  ;;  %s227_s0 = scalar_lea.vmem [#allocation4], %s615_s18 }
  0x62   : > { %v228_v8 = vld [vmem:[%s227_s0] sm:$0x1] }
  0x63   : > { %229 = vst [vmem:[%s527_s19 + $0xb] sm:$0x1] %v228_v8 }
  0x64 PF: > { %s18_s22 = sadd.s32 1, %s436_s22  }
  0x65   : > { %p15_p0 = scmp.ge.s32.totalorder %s18_s22, 4  }
  0x67   :  { %17 = sbr.rel (!%p15_p0) target bundleno = 13 (0xd), region = 68 }
  0x6e   :  { %251 = vsyncpa [#allocation5], 1 }
  0x6f   :  { %253 = vsyncpa [#allocation5 + $0x1], 1 }

</bundles_post_ra>
